<compile_context>
chip_gen: v5e
topology: v5e:2x2
jax: 0.10.0
libtpu: 0.0.40
codegen_flags: <defaults>
</compile_context>

<pallas_src>
import functools
import math

import jax
import jax.numpy as jnp
from jax.experimental import pallas as pl
from jax.experimental.pallas import tpu as pltpu


# ----------------------------- Pallas kernel --------------------------------

def _interp_kernel(x_ref, w_ref, o_ref):
    # x_ref: (TM, K)  w_ref: (K, NOUT)  o_ref: (TM, NOUT)
    o_ref[...] = jnp.dot(
        x_ref[...], w_ref[...], preferred_element_type=jnp.float32
    ).astype(o_ref.dtype)


def _round_up(x: int, m: int) -> int:
    return ((x + m - 1) // m) * m


@functools.lru_cache(maxsize=1)
def _tpu_vmem_bytes() -> int:
    """Physical per-core VMEM; conservative default if the query is unavailable."""
    try:
        return int(pltpu.get_tpu_info().vmem_capacity_bytes)
    except Exception:
        return 64 * 1024 * 1024  # v7x per-core size — safe lower bound everywhere


def _pack_factor(f_in: int, f_out: int) -> int:
    """Smallest r with r*f_in and r*f_out both multiples of 128 (lane-dense),
    falling back to 1 if that would make the block-diagonal W unreasonably big."""
    r_in = 128 // math.gcd(f_in, 128)
    r_out = 128 // math.gcd(f_out, 128)
    r = r_in * r_out // math.gcd(r_in, r_out)
    if r > 128 or (r * f_in) * (r * f_out) * 4 > (8 << 20):
        return 1
    return r


def _pallas_matmul(x_packed, w_eff, *, tm: int):
    n_rows, k = x_packed.shape
    n_out = w_eff.shape[1]
    itemsize = jnp.dtype(x_packed.dtype).itemsize
    w_itemsize = jnp.dtype(w_eff.dtype).itemsize
    k_pad = _round_up(k, 128)
    o_pad = _round_up(n_out, 128)

    # Real VMEM footprint: double-buffered in/out row tiles + W (2 buffers) + headroom.
    vmem_needed = (2 * tm * (k_pad + o_pad) * itemsize
                   + 2 * k_pad * o_pad * w_itemsize
                   + (1 << 20))
    vmem_limit = int(min(max(vmem_needed, 16 << 20), _tpu_vmem_bytes() * 3 // 4))

    return pl.pallas_call(
        _interp_kernel,
        out_shape=jax.ShapeDtypeStruct((n_rows, n_out), x_packed.dtype),
        grid=(pl.cdiv(n_rows, tm),),
        in_specs=[
            pl.BlockSpec((tm, k), lambda i: (i, 0)),      # streamed row tile
            pl.BlockSpec((k, n_out), lambda i: (0, 0)),   # W resident (block index constant)
        ],
        out_specs=pl.BlockSpec((tm, n_out), lambda i: (i, 0)),
        compiler_params=pltpu.CompilerParams(
            dimension_semantics=("parallel",),
            vmem_limit_bytes=vmem_limit,
        ),
        cost_estimate=pl.CostEstimate(
            flops=2 * n_rows * k * n_out,
            bytes_accessed=itemsize * (n_rows * k + n_rows * n_out)
                           + w_itemsize * k * n_out,
            transcendentals=0,
        ),
    )(x_packed, w_eff)


@functools.partial(jax.jit, static_argnames=("r", "apply_gate"))
def _interp_pallas_packed(x2d, w_block, mask, *, r: int, apply_gate: bool):
    """y = interp(x2d) [* sigmoid(mask)*2], via a lane-dense row-packed matmul."""
    n, f_in = x2d.shape
    f_out = mask.shape[0]
    k = r * f_in
    n_out = r * f_out

    # Fold the (per-call, live) gate into the packed weight outside the kernel.
    if apply_gate:
        gate = jax.nn.sigmoid(mask.astype(jnp.float32)) * 2.0
        w_eff = w_block * jnp.tile(gate, r)[None, :]
    else:
        w_eff = w_block
    if x2d.dtype == jnp.bfloat16:
        w_eff = w_eff.astype(jnp.bfloat16)  # f32 accumulation kept in the kernel

    itemsize = jnp.dtype(x2d.dtype).itemsize
    sub = 16 if itemsize == 2 else 8

    # Pad rows so the packed row count is sublane-aligned, then pack r rows per row.
    n_al = _round_up(n, r * sub)
    if n_al != n:
        x2d = jnp.pad(x2d, ((0, n_al - n), (0, 0)))
    n_rows = n_al // r
    x_packed = x2d.reshape(n_rows, k)  # contiguous -> free

    # Per-generation tile budget (lane-padding aware, real itemsize).
    tile_budget = min(_tpu_vmem_bytes() // 4, 28 << 20)
    k_pad = _round_up(k, 128)
    o_pad = _round_up(n_out, 128)
    bytes_per_row = 2 * itemsize * (k_pad + o_pad)     # in + out, double-buffered
    tm_cap = max(sub, (tile_budget // bytes_per_row) // sub * sub)
    tm = int(min(32768, tm_cap, n_rows))

    y_packed = _pallas_matmul(x_packed, w_eff, tm=tm)
    return y_packed.reshape(n_al, f_out)[:n]


# Small-slab fallback: pallas_call launch/pipeline overhead dwarfs the work.
_SMALL_SLAB_ELEMS = 4096


@functools.partial(jax.jit, static_argnames=("apply_gate",))
def _interp_small(x2d, w, mask, *, apply_gate: bool):
    y = x2d.astype(jnp.float32) @ w
    if apply_gate:
        y = y * (jax.nn.sigmoid(mask.astype(jnp.float32)) * 2.0)[None, :]
    return y.astype(x2d.dtype)


# ------------------------------- glue / setup -------------------------------

def _linear_interp_matrix(in_size: int, out_size: int) -> jnp.ndarray:
    """W (in_size, out_size) with x2d @ W == F.interpolate(x2d[:, None, :],
    out_size, mode='linear', align_corners=True)[:, 0, :]."""
    j = jnp.arange(out_size, dtype=jnp.float32)
    if out_size > 1:
        c = j * (float(in_size - 1) / float(out_size - 1))
    else:
        c = jnp.zeros_like(j)
    i0 = jnp.floor(c).astype(jnp.int32)
    i1 = jnp.minimum(i0 + 1, in_size - 1)
    frac = c - i0.astype(jnp.float32)
    rows = jnp.arange(in_size, dtype=jnp.int32)[:, None]
    w = (rows == i0[None, :]).astype(jnp.float32) * (1.0 - frac)[None, :] \
      + (rows == i1[None, :]).astype(jnp.float32) * frac[None, :]
    return w


class TimeDistributedInterpolation:
    """JAX/Pallas port of the PyTorch TimeDistributedInterpolation module."""

    def __init__(self, output_size: int, batch_first: bool = False,
                 trainable: bool = False, mask: jnp.ndarray | None = None):
        self.output_size = output_size
        self.batch_first = batch_first
        self.trainable = trainable
        if self.trainable:
            # nn.Parameter(torch.zeros(output_size)) in the reference __init__;
            # a deterministic override may be passed in for testing.
            self.mask = (mask if mask is not None
                         else jnp.zeros((output_size,), jnp.float32))
        # Caches hold only the *fixed* interpolation matrices (gate applied per call).
        self._w_cache: dict[int, jnp.ndarray] = {}
        self._wblock_cache: dict[tuple[int, int], jnp.ndarray] = {}

    def _base_w(self, f_in: int) -> jnp.ndarray:
        w = self._w_cache.get(f_in)
        if w is None:
            w = _linear_interp_matrix(f_in, self.output_size)
            self._w_cache[f_in] = w
        return w

    def _block_w(self, f_in: int, r: int) -> jnp.ndarray:
        key = (f_in, r)
        wb = self._wblock_cache.get(key)
        if wb is None:
            wb = jnp.kron(jnp.eye(r, dtype=jnp.float32), self._base_w(f_in))
            self._wblock_cache[key] = wb
        return wb

    # ---------------------------- hot path ----------------------------------
    def _interpolate(self, x2d: jnp.ndarray) -> jnp.ndarray:
        n, f_in = x2d.shape
        f_out = self.output_size
        mask = self.mask if self.trainable else jnp.zeros((f_out,), jnp.float32)
        if n * f_out <= _SMALL_SLAB_ELEMS:
            return _interp_small(x2d, self._base_w(f_in), mask,
                                 apply_gate=self.trainable)
        r = _pack_factor(f_in, f_out)
        return _interp_pallas_packed(x2d, self._block_w(f_in, r), mask,
                                     r=r, apply_gate=self.trainable)

    def __call__(self, x: jnp.ndarray) -> jnp.ndarray:
        if x.ndim <= 2:
            return self._interpolate(x)
        x2d = x.reshape(-1, x.shape[-1])            # x.contiguous().view(-1, x.size(-1))
        y = self._interpolate(x2d)
        if self.batch_first:
            return y.reshape(x.shape[0], -1, y.shape[-1])
        return y.reshape(-1, x.shape[1], y.shape[-1])


# --------------------------- pure-JAX reference ------------------------------

def _ref_forward(x, output_size, batch_first, mask):
    x2d = x.reshape(-1, x.shape[-1]) if x.ndim > 2 else x
    in_size = x2d.shape[-1]
    j = jnp.arange(output_size, dtype=jnp.float32)
    c = (j * (float(in_size - 1) / float(output_size - 1))
         if output_size > 1 else jnp.zeros_like(j))
    i0 = jnp.floor(c).astype(jnp.int32)
    i1 = jnp.minimum(i0 + 1, in_size - 1)
    frac = c - i0.astype(jnp.float32)
    y = x2d[:, i0] * (1.0 - frac)[None, :] + x2d[:, i1] * frac[None, :]
    if mask is not None:
        y = y * jax.nn.sigmoid(mask)[None, :] * 2.0
    if x.ndim <= 2:
        return y
    if batch_first:
        return y.reshape(x.shape[0], -1, y.shape[-1])
    return y.reshape(-1, x.shape[1], y.shape[-1])


# ----------------------------------- main ------------------------------------

if __name__ == "__main__":
    key = jax.random.PRNGKey(0)
    kx, km, kp = jax.random.split(key, 3)

    T, B, F_IN, F_OUT = 32, 8, 16, 32
    x = jax.random.normal(kx, (T, B, F_IN), dtype=jnp.float32)   # (time, batch, features)
    # Deterministic non-zero mask so the trainable gate path is exercised
    # (the reference zero-inits it; sigmoid(0)*2 would just be 1).
    mask = 0.1 * jax.random.normal(km, (F_OUT,), dtype=jnp.float32)

    # 1) Trainable (gated) path, 3-D input, Pallas lane-dense packed kernel.
    mod = TimeDistributedInterpolation(F_OUT, batch_first=False,
                                       trainable=True, mask=mask)
    y = jax.block_until_ready(mod(x))
    y_ref = _ref_forward(x, F_OUT, batch_first=False, mask=mask)
    assert y.shape == (T, B, F_OUT), y.shape
    assert jnp.allclose(y, y_ref, atol=1e-5, rtol=1e-5), \
        float(jnp.max(jnp.abs(y - y_ref)))

    # 2) batch_first + non-trainable, row count not divisible by the pack factor
    #    (exercises the pad/slice path around the Pallas call).
    x_odd = jax.random.normal(kp, (25, 12, F_IN), dtype=jnp.float32)
    mod_bf = TimeDistributedInterpolation(F_OUT, batch_first=True, trainable=False)
    y_bf = jax.block_until_ready(mod_bf(x_odd))
    y_bf_ref = _ref_forward(x_odd, F_OUT, batch_first=True, mask=None)
    assert y_bf.shape == (25, 12, F_OUT), y_bf.shape
    assert jnp.allclose(y_bf, y_bf_ref, atol=1e-5, rtol=1e-5), \
        float(jnp.max(jnp.abs(y_bf - y_bf_ref)))

    # 3) Tiny 2-D input -> small-slab fallback path.
    x2d = jax.random.normal(kx, (16, F_IN), dtype=jnp.float32)
    mod2 = TimeDistributedInterpolation(F_OUT, batch_first=False, trainable=False)
    y2 = jax.block_until_ready(mod2(x2d))
    y2_ref = _ref_forward(x2d, F_OUT, batch_first=False, mask=None)
    assert y2.shape == (16, F_OUT), y2.shape
    assert jnp.allclose(y2, y2_ref, atol=1e-5, rtol=1e-5), \
        float(jnp.max(jnp.abs(y2 - y2_ref)))

    print("KERNEL_OK")
</pallas_src>

<mosaic_0001>
module attributes {stable_mosaic.version = 11 : i64} {
  func.func @_interp_kernel(%arg0: i32, %arg1: memref<32x128xf32, #tpu.memory_space<vmem>>, %arg2: memref<128x256xf32, #tpu.memory_space<vmem>>, %arg3: memref<32x256xf32, #tpu.memory_space<vmem>>) attributes {dimension_semantics = [#tpu.dimension_semantics<parallel>], iteration_bounds = array<i64: 1>, scalar_prefetch = 0 : i64, scratch_operands = 0 : i64, tpu.core_type = #tpu.core_type<tc>, window_params = [{transform_indices = @transform_0, window_bounds = array<i64: 32, 128>}, {pipeline_mode = #tpu.pipeline_mode<synchronous>, transform_indices = @transform_1, window_bounds = array<i64: 128, 256>}, {transform_indices = @transform_2, window_bounds = array<i64: 32, 256>}]} {
    %c0 = arith.constant 0 : index
    %c0_0 = arith.constant 0 : index
    %0 = vector.load %arg1[%c0, %c0_0] : memref<32x128xf32, #tpu.memory_space<vmem>>, vector<32x128xf32>
    %c0_1 = arith.constant 0 : index
    %c0_2 = arith.constant 0 : index
    %1 = vector.load %arg2[%c0_1, %c0_2] : memref<128x256xf32, #tpu.memory_space<vmem>>, vector<128x256xf32>
    %cst = arith.constant dense<0.000000e+00> : vector<32x256xf32>
    %2 = tpu.matmul %0, %1, %cst {dimension_numbers = #tpu.dot_dimension_numbers<[1], [0], [0], [1], [0, 0, 1, 1], [], []>} : vector<32x128xf32>, vector<128x256xf32>, vector<32x256xf32> -> vector<32x256xf32>
    %c0_3 = arith.constant 0 : index
    %c0_4 = arith.constant 0 : index
    %3 = vector.load %arg3[%c0_3, %c0_4] : memref<32x256xf32, #tpu.memory_space<vmem>>, vector<32x256xf32>
    tpu.vector_store %arg3[%c0_3, %c0_4], %2 {strides = array<i32>} : memref<32x256xf32, #tpu.memory_space<vmem>>, vector<32x256xf32>,
    return
  }
  func.func @transform_0(%arg0: i32) -> (i32, i32) {
    %c0_i32 = arith.constant 0 : i32
    %c0_i32_0 = arith.constant 0 : i32
    return %arg0, %c0_i32 : i32, i32
  }
  func.func @transform_1(%arg0: i32) -> (i32, i32) {
    %c0_i32 = arith.constant 0 : i32
    %c0_i32_0 = arith.constant 0 : i32
    %c0_i32_1 = arith.constant 0 : i32
    return %c0_i32, %c0_i32_0 : i32, i32
  }
  func.func @transform_2(%arg0: i32) -> (i32, i32) {
    %c0_i32 = arith.constant 0 : i32
    %c0_i32_0 = arith.constant 0 : i32
    return %arg0, %c0_i32 : i32, i32
  }
}

</mosaic_0001>

<bundles_post_ra>
// kernel: tile.8
= control target key start
LH: loop header
LB: loop body
LE: loop exit
PB: predicated region body
PF: predicated region fallthrough
CT: control target
= control target key end

     0   :  { %s22_s0 = inlined_call_operand.vmem [shape: f32[32], index: 0, kind: input, shape index: {}]   ;;  %s23_s1 = inlined_call_operand.vmem [shape: f32[8,32], index: 1, kind: output, shape index: {}]  }
   0x1   :  { %v4_v0 = vld [vmem:[%s22_s0] ss:$0 sm:$0xff] }
   0x2   :  { %5 = vst [vmem:[%s23_s1] sm:$0xff] %v4_v0 }

// kernel: mul.9
= control target key start
LH: loop header
LB: loop body
LE: loop exit
PB: predicated region body
PF: predicated region fallthrough
CT: control target
= control target key end

     0   :  { %s7_s6 = smov 3  ;;  %s39_s9 = smov 96   ;;  %vm4_vm0 = vcmask 261120   ;;  %vm11_vm1 = vcmask 1048320   ;;  %vm18_vm2 = vcmask 785920   ;;  %vm25_vm3 = vcmask 523520   ;;  %s67_s0 = inlined_call_operand.vmem [shape: f32[8,32], index: 0, kind: input, shape index: {}]   ;;  %s68_s1 = inlined_call_operand.vmem [shape: f32[256], index: 1, kind: output, shape index: {}]  }
   0x1   :  { %v33_v0 = vld [vmem:[%s67_s0 + $0x3] ss:$4 sm:%s7_s6]   ;;  %s21_s10 = smov 3  ;;  %s14_s13 = smov 3 }
   0x2   :  { %9 = vrot.lane.b32.xlu0 %v33_v0, %s39_s9  ;;  %v35_v1 = vld [vmem:[%s67_s0 + $0x1] ss:$4 sm:%s21_s10]   ;;  %s40_s14 = smov 32   ;;  %s41_s17 = smov 64  }
   0x3   :  { %23 = vrot.lane.b32.xlu1 %v35_v1, %s40_s14  ;;  %v34_v2 = vld [vmem:[%s67_s0 + $0x2] ss:$4 sm:%s14_s13]   ;;  %s2_s18 = smov 3 }
   0x4   :  { %v3_v3 = vld [vmem:[%s67_s0] ss:$4 sm:%s2_s18]  }
   0x5   :  { %5 = vst.msk [vmem:[#allocation0] sm:$0x3] %vm4_vm0, %v3_v3  }
   0xa   :  { %16 = vrot.lane.b32.xlu0 %v34_v2, %s41_s17 }
  0x74   :  { %v10_v4 = vpop.permute.xlu0 %9  }
  0x75   :  { %12 = vst.msk [vmem:[#allocation0] sm:$0x3] %vm11_vm1, %v10_v4   ;;  %v24_v5 = vpop.permute.xlu1 %23  }
  0x7c   :  { %v17_v6 = vpop.permute.xlu0 %16  }
  0x7d   :  { %19 = vst.msk [vmem:[#allocation0] sm:$0x3] %vm18_vm2, %v17_v6  }
  0x7e   :  { %26 = vst.msk [vmem:[#allocation0] sm:$0x3] %vm25_vm3, %v24_v5  }
  0x85   :  { %v29_v7 = vld [vmem:[#allocation0] sm:$0x3] }
  0x86   :  { %32 = vst [vmem:[%s68_s1] sm:$0x3] %v29_v7 }

// kernel: _interp_pallas_packed.1
= control target key start
LH: loop header
LB: loop body
LE: loop exit
PB: predicated region body
PF: predicated region fallthrough
CT: control target
= control target key end

     0   :  { %s296_s1 = inlined_call_operand.vmem [shape: f32[128,256], index: 1, kind: input, shape index: {}]   ;;  %s297_s0 = inlined_call_operand.vmem [shape: f32[32,128], index: 0, kind: input, shape index: {}]   ;;  %s298_s2 = inlined_call_operand.vmem [shape: f32[32,256], index: 2, kind: output, shape index: {}]  }
   0x1   :  { %v45_v0 = vld [vmem:[%s296_s1 + $0xf0] sm:$0xff]  ;;  %v46_v1 = vld [vmem:[%s296_s1 + $0xf8] sm:$0xff]  ;;  %v43_v2 = vld [vmem:[%s296_s1 + $0xe0] sm:$0xff] }
   0x2   :  { %117 = vmatpush.msra.mxu2 %v45_v0  ;;  %133 = vmatpush.msra.mxu3 %v46_v1  ;;  %v44_v3 = vld [vmem:[%s296_s1 + $0xe8] sm:$0xff]  ;;  %v41_v4 = vld [vmem:[%s296_s1 + $0xd0] sm:$0xff]  ;;  %v42_v5 = vld [vmem:[%s296_s1 + $0xd8] sm:$0xff] }
   0x3   :  { %47 = vmatpush.msra.mxu0 %v45_v0  ;;  %76 = vmatpush.msra.mxu1 %v46_v1  ;;  %v39_v6 = vld [vmem:[%s296_s1 + $0xc0] sm:$0xff]  ;;  %v40_v7 = vld [vmem:[%s296_s1 + $0xc8] sm:$0xff]  ;;  %v37_v8 = vld [vmem:[%s296_s1 + $0xb0] sm:$0xff] }
   0x4   :  { %118 = vmatpush.msra.mxu2 %v43_v2  ;;  %134 = vmatpush.msra.mxu3 %v44_v3  ;;  %v38_v9 = vld [vmem:[%s296_s1 + $0xb8] sm:$0xff]  ;;  %v35_v10 = vld [vmem:[%s296_s1 + $0xa0] sm:$0xff]  ;;  %v36_v11 = vld [vmem:[%s296_s1 + $0xa8] sm:$0xff] }
   0x5   :  { %48 = vmatpush.msra.mxu0 %v43_v2  ;;  %77 = vmatpush.msra.mxu1 %v44_v3  ;;  %v33_v12 = vld [vmem:[%s296_s1 + $0x90] sm:$0xff]  ;;  %v34_v13 = vld [vmem:[%s296_s1 + $0x98] sm:$0xff]  ;;  %v31_v14 = vld [vmem:[%s296_s1 + $0x80] sm:$0xff] }
   0x6   :  { %119 = vmatpush.msra.mxu2 %v41_v4  ;;  %135 = vmatpush.msra.mxu3 %v42_v5  ;;  %v32_v15 = vld [vmem:[%s296_s1 + $0x88] sm:$0xff]  ;;  %v29_v16 = vld [vmem:[%s296_s1 + $0x70] sm:$0xff]  ;;  %v30_v17 = vld [vmem:[%s296_s1 + $0x78] sm:$0xff] }
   0x7   :  { %49 = vmatpush.msra.mxu0 %v41_v4  ;;  %78 = vmatpush.msra.mxu1 %v42_v5  ;;  %v27_v18 = vld [vmem:[%s296_s1 + $0x60] sm:$0xff]  ;;  %v28_v19 = vld [vmem:[%s296_s1 + $0x68] sm:$0xff]  ;;  %v25_v20 = vld [vmem:[%s296_s1 + $0x50] sm:$0xff] }
   0x8   :  { %120 = vmatpush.msra.mxu2 %v39_v6  ;;  %136 = vmatpush.msra.mxu3 %v40_v7  ;;  %v26_v21 = vld [vmem:[%s296_s1 + $0x58] sm:$0xff]  ;;  %v23_v22 = vld [vmem:[%s296_s1 + $0x40] sm:$0xff]  ;;  %v24_v23 = vld [vmem:[%s296_s1 + $0x48] sm:$0xff] }
   0x9   :  { %50 = vmatpush.msra.mxu0 %v39_v6  ;;  %79 = vmatpush.msra.mxu1 %v40_v7  ;;  %v21_v24 = vld [vmem:[%s296_s1 + $0x30] sm:$0xff]  ;;  %v22_v25 = vld [vmem:[%s296_s1 + $0x38] sm:$0xff]  ;;  %v19_v26 = vld [vmem:[%s296_s1 + $0x20] sm:$0xff] }
   0xa   :  { %121 = vmatpush.msra.mxu2 %v37_v8  ;;  %137 = vmatpush.msra.mxu3 %v38_v9  ;;  %v20_v27 = vld [vmem:[%s296_s1 + $0x28] sm:$0xff]  ;;  %v17_v28 = vld [vmem:[%s296_s1 + $0x10] sm:$0xff]  ;;  %v18_v29 = vld [vmem:[%s296_s1 + $0x18] sm:$0xff] }
   0xb   :  { %51 = vmatpush.msra.mxu0 %v37_v8  ;;  %80 = vmatpush.msra.mxu1 %v38_v9  ;;  %v15_v30 = vld [vmem:[%s296_s1] sm:$0xff]  ;;  %v16_v31 = vld [vmem:[%s296_s1 + $0x8] sm:$0xff]  ;;  %v13_v32 = vld [vmem:[%s297_s0 + $0x10] sm:$0xff] }
   0xc   :  { %122 = vmatpush.msra.mxu2 %v35_v10  ;;  %138 = vmatpush.msra.mxu3 %v36_v11  ;;  %v11_v33 = vld [vmem:[%s297_s0] sm:$0xff]  ;;  %v14_v34 = vld [vmem:[%s297_s0 + $0x18] sm:$0xff]  ;;  %v12_v35 = vld [vmem:[%s297_s0 + $0x8] sm:$0xff] }
   0xd   :  { %52 = vmatpush.msra.mxu0 %v35_v10  ;;  %81 = vmatpush.msra.mxu1 %v36_v11 }
   0xe   :  { %123 = vmatpush.msra.mxu2 %v33_v12  ;;  %139 = vmatpush.msra.mxu3 %v34_v13 }
   0xf   :  { %53 = vmatpush.msra.mxu0 %v33_v12  ;;  %82 = vmatpush.msra.mxu1 %v34_v13 }
  0x10   :  { %124 = vmatpush.msra.mxu2 %v31_v14  ;;  %140 = vmatpush.msra.mxu3 %v32_v15 }
  0x11   :  { %54 = vmatpush.msra.mxu0 %v31_v14  ;;  %83 = vmatpush.msra.mxu1 %v32_v15 }
  0x12   :  { %125 = vmatpush.msra.mxu2 %v29_v16  ;;  %141 = vmatpush.msra.mxu3 %v30_v17 }
  0x13   :  { %55 = vmatpush.msra.mxu0 %v29_v16  ;;  %84 = vmatpush.msra.mxu1 %v30_v17 }
  0x14   :  { %126 = vmatpush.msra.mxu2 %v27_v18  ;;  %142 = vmatpush.msra.mxu3 %v28_v19 }
  0x15   :  { %56 = vmatpush.msra.mxu0 %v27_v18  ;;  %85 = vmatpush.msra.mxu1 %v28_v19 }
  0x16   :  { %127 = vmatpush.msra.mxu2 %v25_v20  ;;  %143 = vmatpush.msra.mxu3 %v26_v21 }
  0x17   :  { %57 = vmatpush.msra.mxu0 %v25_v20  ;;  %86 = vmatpush.msra.mxu1 %v26_v21 }
  0x18   :  { %128 = vmatpush.msra.mxu2 %v23_v22  ;;  %144 = vmatpush.msra.mxu3 %v24_v23 }
  0x19   :  { %58 = vmatpush.msra.mxu0 %v23_v22  ;;  %87 = vmatpush.msra.mxu1 %v24_v23 }
  0x1a   :  { %129 = vmatpush.msra.mxu2 %v21_v24  ;;  %145 = vmatpush.msra.mxu3 %v22_v25 }
  0x1b   :  { %59 = vmatpush.msra.mxu0 %v21_v24  ;;  %88 = vmatpush.msra.mxu1 %v22_v25 }
  0x1c   :  { %130 = vmatpush.msra.mxu2 %v19_v26  ;;  %146 = vmatpush.msra.mxu3 %v20_v27 }
  0x1d   :  { %60 = vmatpush.msra.mxu0 %v19_v26  ;;  %89 = vmatpush.msra.mxu1 %v20_v27 }
  0x1e   :  { %131 = vmatpush.msra.mxu2 %v17_v28  ;;  %147 = vmatpush.msra.mxu3 %v18_v29 }
  0x1f   :  { %61 = vmatpush.msra.mxu0 %v17_v28  ;;  %90 = vmatpush.msra.mxu1 %v18_v29 }
  0x20   :  { %132 = vmatpush.msra.mxu2 %v15_v30  ;;  %148 = vmatpush.msra.mxu3 %v16_v31 }
  0x21   :  { %69 = vmatmul.f32.vlgmr.msra.gmra.mxu2 %v13_v32  ;;  %98 = vmatmul.f32.vlgmr.msra.gmra.mxu3 %v13_v32 }
  0x22   :  { %62 = vmatpush.msra.mxu0 %v15_v30  ;;  %91 = vmatpush.msra.mxu1 %v16_v31 }
  0x23   :  { %63 = vmatmul.f32.vlgmr.msra.gmra.mxu0 %v11_v33  ;;  %92 = vmatmul.f32.vlgmr.msra.gmra.mxu1 %v11_v33 }
  0x29   :  { %72 = vmatmul.f32.gmra.mxu2 %v14_v34  ;;  %101 = vmatmul.f32.gmra.mxu3 %v14_v34 }
  0x2b   :  { %66 = vmatmul.f32.gmra.mxu0 %v12_v35  ;;  %95 = vmatmul.f32.gmra.mxu1 %v12_v35 }
  0xa0   :  { %v64_v36 = vpop.f32.mrf.mxu0  ;;  %v93_v37 = vpop.f32.mrf.mxu1 }
  0xa1   :  { %105 = vst [vmem:[%s298_s2] sm:$0xff] %v64_v36 }
  0xa2   :  { %106 = vst [vmem:[%s298_s2 + $0x8] sm:$0xff] %v93_v37 }
  0xa4   :  { %v70_v38 = vpop.f32.mrf.mxu2  ;;  %v99_v39 = vpop.f32.mrf.mxu3 }
  0xa5   :  { %109 = vst [vmem:[%s298_s2 + $0x20] sm:$0xff] %v70_v38 }
  0xa6   :  { %110 = vst [vmem:[%s298_s2 + $0x28] sm:$0xff] %v99_v39 }
  0xa8   :  { %v67_v40 = vpop.f32.mrf.mxu0  ;;  %v96_v41 = vpop.f32.mrf.mxu1 }
  0xa9   :  { %107 = vst [vmem:[%s298_s2 + $0x10] sm:$0xff] %v67_v40 }
  0xaa   :  { %108 = vst [vmem:[%s298_s2 + $0x18] sm:$0xff] %v96_v41 }
  0xac   :  { %v73_v42 = vpop.f32.mrf.mxu2  ;;  %v102_v43 = vpop.f32.mrf.mxu3 }
  0xad   :  { %111 = vst [vmem:[%s298_s2 + $0x30] sm:$0xff] %v73_v42 }
  0xae   :  { %112 = vst [vmem:[%s298_s2 + $0x38] sm:$0xff] %v102_v43 }

</bundles_post_ra>
